<compile_context>
chip_gen: v7x
topology: tpu7x:2x2x1
jax: 0.10.0
libtpu: 0.0.40
codegen_flags: <defaults>
</compile_context>

<pallas_src>
import numpy as np
import jax
import jax.numpy as jnp
from jax.experimental import pallas as pl
from jax.experimental.pallas import tpu as pltpu


def _mismatch_kernel(loss_ref, tgt_ref, gts_ref, tri_ref, out_ref,
                     carry_cum_ref, carry_jac_ref, acc_ref):
    # loss_ref: (R, T) f32   chunk of descending-sorted |t - o|
    # tgt_ref:  (R, T) bf16  target permuted by the same order (0/1 -> lossless)
    # gts_ref:  (R, 1) f32   per-row total of target (permutation invariant)
    # tri_ref:  (T, T) bf16  upper-triangular ones (grid-constant, VMEM resident)
    # out_ref:  (R, 128) f32 per-row lovasz loss broadcast across lanes
    # carries:  (R, 1) f32   running cumsum(gt) / last jaccard / loss accumulator
    k = pl.program_id(1)
    num_k = pl.num_programs(1)

    @pl.when(k == 0)
    def _init():
        carry_cum_ref[...] = jnp.zeros_like(carry_cum_ref)
        carry_jac_ref[...] = jnp.zeros_like(carry_jac_ref)
        acc_ref[...] = jnp.zeros_like(acc_ref)

    loss = loss_ref[...]
    tgt = tgt_ref[...]
    gts = gts_ref[...]
    r, t = loss.shape

    # Inclusive cumsum of this chunk: one (R,T)@(T,T) bf16 MXU matmul, f32 acc.
    cum_local = jnp.dot(tgt, tri_ref[...], preferred_element_type=jnp.float32)
    cum = cum_local + carry_cum_ref[...]            # global inclusive cumsum(gt)

    lane = jax.lax.broadcasted_iota(jnp.int32, (r, t), 1).astype(jnp.float32)
    pos = lane + 1.0 + (k * t).astype(jnp.float32)  # global (m + 1)
    cum_not = pos - cum                             # cumsum(1 - gt), no 2nd matmul

    intersection = gts - cum
    union = gts + cum_not                           # >= 1 for 0/1 targets
    inv = pl.reciprocal(union, approx=True)         # EUP seed
    inv = inv * (2.0 - union * inv)                 # 1 Newton step -> ~f32 accurate
    jaccard = 1.0 - intersection * inv

    # lovasz_grad = first difference of jaccard; previous value carried across
    # chunks (carry starts at 0, matching grad[0] = jaccard[0]).
    shifted = pltpu.roll(jaccard, shift=1, axis=1)  # XLU lane rotate (free slot)
    lane_i = jax.lax.broadcasted_iota(jnp.int32, (r, t), 1)
    prev = jnp.where(lane_i == 0,
                     jnp.broadcast_to(carry_jac_ref[...], (r, t)), shifted)
    grad = jaccard - prev

    acc_ref[...] += jnp.sum(loss * grad, axis=1, keepdims=True)
    carry_cum_ref[...] = cum[:, t - 1:t]
    carry_jac_ref[...] = jaccard[:, t - 1:t]

    @pl.when(k == num_k - 1)
    def _finalize():
        out_ref[...] = jnp.broadcast_to(acc_ref[...], (r, 128))


def mismatch_loss(net_out, target, max_positiones, *, t_chunk=None):
    b, c = target.shape[0], target.shape[1]
    n = int(np.prod(target.shape[2:]))
    t = target.reshape(b, c, n).astype(jnp.float32)
    o = net_out.reshape(b, c, n).astype(jnp.float32)
    p = max_positiones.reshape(b, c, n).astype(jnp.float32)

    diff = jnp.abs(t - o)
    # Descending sort of |t - o| carrying the target along: one multi-operand
    # lax.sort (tie order provably does not change the final dot product).
    neg_sorted, tgt_sorted = jax.lax.sort((-diff, t), dimension=-1, num_keys=1)
    loss_sorted = -neg_sorted

    bc = b * c
    # Row tiling over folded (image, class) pairs.  128 matches the v5e MXU;
    # 256 fills v6e/v7x MXU rows while still leaving >=2 parallel row chunks
    # (megacore / v7x two-TensorCore sharding) once bc is large.
    if bc >= 512:
        r_tile = 256
    elif bc >= 128:
        r_tile = 128
    else:
        r_tile = ((bc + 15) // 16) * 16
    bc_pad = ((bc + r_tile - 1) // r_tile) * r_tile
    num_row_chunks = bc_pad // r_tile

    # N (lane) chunking for the blocked cumsum: tri is only (T,T) and MXU work
    # is R*N*T instead of R*N^2.
    if t_chunk is None:
        t_chunk = 256 if n >= 512 else 128
    n_pad = ((n + t_chunk - 1) // t_chunk) * t_chunk
    num_n_chunks = n_pad // t_chunk

    loss_rows = loss_sorted.reshape(bc, n)
    tgt_rows = tgt_sorted.reshape(bc, n).astype(jnp.bfloat16)  # 0/1 -> lossless
    gts_rows = jnp.sum(t, axis=-1).reshape(bc, 1)              # tiny XLA reduce

    row_pad = bc_pad - bc
    lane_pad = n_pad - n
    if row_pad or lane_pad:
        # Padded rows/lanes have loss == 0 and tgt == 0 -> contribute exactly 0.
        loss_rows = jnp.pad(loss_rows, ((0, row_pad), (0, lane_pad)))
        tgt_rows = jnp.pad(tgt_rows, ((0, row_pad), (0, lane_pad)))
    if row_pad:
        gts_rows = jnp.pad(gts_rows, ((0, row_pad), (0, 0)))

    # (T,T) upper-triangular ones = inclusive-cumsum operator; grid-constant
    # index_map -> DMA'd once and kept VMEM resident.
    row_i = jax.lax.broadcasted_iota(jnp.int32, (t_chunk, t_chunk), 0)
    col_i = jax.lax.broadcasted_iota(jnp.int32, (t_chunk, t_chunk), 1)
    tri = (row_i <= col_i).astype(jnp.bfloat16)

    # Explicit VMEM budget: double-buffered row tiles + tri + output + scratch
    # (lane-padded), with 2x headroom; the 16/32 MiB scoped defaults otherwise
    # throttle larger T / r_tile even though physical VMEM is available.
    vmem_bytes = 2 * (
        2 * r_tile * t_chunk * 4        # loss tiles (f32, double-buffered)
        + 2 * r_tile * t_chunk * 2      # tgt tiles (bf16, double-buffered)
        + 2 * t_chunk * t_chunk * 2     # tri (bf16)
        + 2 * r_tile * 128 * 4          # gts tiles (lane-padded)
        + 2 * r_tile * 128 * 4          # output tile
        + 3 * r_tile * 128 * 4          # scratch carries (lane-padded)
    )
    vmem_limit = int(min(max(vmem_bytes, 16 * 1024 * 1024), 100 * 1024 * 1024))

    per_row = pl.pallas_call(
        _mismatch_kernel,
        out_shape=jax.ShapeDtypeStruct((bc_pad, 128), jnp.float32),
        grid_spec=pltpu.PrefetchScalarGridSpec(
            num_scalar_prefetch=0,
            grid=(num_row_chunks, num_n_chunks),      # reduction (N) axis last
            in_specs=[
                pl.BlockSpec((r_tile, t_chunk), lambda j, k: (j, k)),
                pl.BlockSpec((r_tile, t_chunk), lambda j, k: (j, k)),
                pl.BlockSpec((r_tile, 1), lambda j, k: (j, 0)),
                pl.BlockSpec((t_chunk, t_chunk), lambda j, k: (0, 0)),  # tri
            ],
            out_specs=pl.BlockSpec((r_tile, 128), lambda j, k: (j, 0)),
            scratch_shapes=[
                pltpu.VMEM((r_tile, 1), jnp.float32),   # running cumsum(gt) carry
                pltpu.VMEM((r_tile, 1), jnp.float32),   # last-jaccard carry
                pltpu.VMEM((r_tile, 1), jnp.float32),   # per-row loss accumulator
            ],
        ),
        compiler_params=pltpu.CompilerParams(
            dimension_semantics=("parallel", "arbitrary"),
            vmem_limit_bytes=vmem_limit,
        ),
    )(loss_rows, tgt_rows, gts_rows, tri)

    per_class = per_row[:bc, 0].reshape(b, c)                  # (B, C)

    # Skip classes with all-zero target AND all-zero max_positiones; keeps the
    # heavy (B,C,N) max_positiones tensor out of kernel DMA traffic.
    skip = (jnp.max(t, axis=-1) == 0.0) & (jnp.max(p, axis=-1) == 0.0)
    losses = jnp.where(skip, 0.0, per_class)
    cnt = jnp.sum((losses != 0.0).astype(jnp.float32), axis=-1)  # count_nonzero
    img_losses = jnp.sum(losses, axis=-1) / cnt                  # 0/0 -> NaN (as torch)
    return jnp.sum(img_losses) / b


# ---------------- pure-JAX reference (for correctness check) ----------------
def _lovasz_grad_ref(gt_sorted):
    gts = gt_sorted.sum(axis=-1, keepdims=True)
    inter = gts - jnp.cumsum(gt_sorted, axis=-1)
    union = gts + jnp.cumsum(1.0 - gt_sorted, axis=-1)
    jac = 1.0 - inter / union
    return jnp.concatenate([jac[..., :1], jac[..., 1:] - jac[..., :-1]], axis=-1)


def mismatch_loss_ref(net_out, target, max_positiones):
    b, c = target.shape[0], target.shape[1]
    n = int(np.prod(target.shape[2:]))
    t = target.reshape(b, c, n).astype(jnp.float32)
    o = net_out.reshape(b, c, n).astype(jnp.float32)
    p = max_positiones.reshape(b, c, n).astype(jnp.float32)
    diff = jnp.abs(t - o)
    order = jnp.argsort(-diff, axis=-1)
    loss_sorted = jnp.take_along_axis(diff, order, axis=-1)
    tgt_sorted = jnp.take_along_axis(t, order, axis=-1)
    per_class = jnp.sum(loss_sorted * _lovasz_grad_ref(tgt_sorted), axis=-1)  # (B, C)
    skip = (t.max(axis=-1) == 0.0) & (p.max(axis=-1) == 0.0)
    losses = jnp.where(skip, 0.0, per_class)
    img = losses.sum(axis=-1) / jnp.count_nonzero(losses, axis=-1).astype(jnp.float32)
    return img.sum() / b


if __name__ == "__main__":
    B, C, H, W = 2, 4, 16, 16
    key = jax.random.PRNGKey(0)
    k1, k2, k3 = jax.random.split(key, 3)

    net_out = jax.random.uniform(k1, (B, C, H, W), dtype=jnp.float32)
    target = (jax.random.uniform(k2, (B, C, H, W)) > 0.5).astype(jnp.float32)
    max_positiones = (jax.random.uniform(k3, (B, C, H, W)) > 0.5).astype(jnp.float32)

    # Exercise the "skip" branch: class 1 of image 0 has all-zero target & positions.
    target = target.at[0, 1].set(0.0)
    max_positiones = max_positiones.at[0, 1].set(0.0)

    # N = 256 with T = 128 -> two N-chunks, exercising the cross-chunk carries.
    out = jax.jit(mismatch_loss)(net_out, target, max_positiones)
    out = jax.block_until_ready(out)

    ref = jax.block_until_ready(mismatch_loss_ref(net_out, target, max_positiones))
    np.testing.assert_allclose(np.asarray(out), np.asarray(ref), rtol=1e-4, atol=1e-5)

    print("KERNEL_OK")
</pallas_src>

<mosaic_0001>
module attributes {stable_mosaic.version = 11 : i64} {
  func.func @_mismatch_kernel(%arg0: i32, %arg1: i32, %arg2: memref<16x128xf32, #tpu.memory_space<vmem>>, %arg3: memref<16x128xbf16, #tpu.memory_space<vmem>>, %arg4: memref<16x1xf32, #tpu.memory_space<vmem>>, %arg5: memref<128x128xbf16, #tpu.memory_space<vmem>>, %arg6: memref<16x128xf32, #tpu.memory_space<vmem>>, %arg7: memref<16x1xf32, #tpu.memory_space<vmem>>, %arg8: memref<16x1xf32, #tpu.memory_space<vmem>>, %arg9: memref<16x1xf32, #tpu.memory_space<vmem>>) attributes {dimension_semantics = [#tpu.dimension_semantics<parallel>, #tpu.dimension_semantics<arbitrary>], iteration_bounds = array<i64: 1, 2>, scalar_prefetch = 0 : i64, scratch_operands = 3 : i64, tpu.core_type = #tpu.core_type<tc>, window_params = [{transform_indices = @transform_0, window_bounds = array<i64: 16, 128>}, {transform_indices = @transform_1, window_bounds = array<i64: 16, 128>}, {transform_indices = @transform_2, window_bounds = array<i64: 16, 1>}, {pipeline_mode = #tpu.pipeline_mode<synchronous>, transform_indices = @transform_3, window_bounds = array<i64: 128, 128>}, {transform_indices = @transform_4, window_bounds = array<i64: 16, 128>}]} {
    %c0_i32 = arith.constant 0 : i32
    %0 = arith.cmpi eq, %arg1, %c0_i32 : i32
    %1 = arith.extui %0 : i1 to i32
    %c0_i32_0 = arith.constant 0 : i32
    %2 = arith.cmpi ne, %1, %c0_i32_0 : i32
    scf.if %2 {
      %cst_27 = arith.constant 0.000000e+00 : f32
      %54 = vector.broadcast %cst_27 : f32 to vector<16x1xf32>
      %c0_28 = arith.constant 0 : index
      %c0_29 = arith.constant 0 : index
      %55 = vector.load %arg7[%c0_28, %c0_29] : memref<16x1xf32, #tpu.memory_space<vmem>>, vector<16x1xf32>
      tpu.vector_store %arg7[%c0_28, %c0_29], %54 {strides = array<i32>} : memref<16x1xf32, #tpu.memory_space<vmem>>, vector<16x1xf32>,
      %cst_30 = arith.constant 0.000000e+00 : f32
      %56 = vector.broadcast %cst_30 : f32 to vector<16x1xf32>
      %c0_31 = arith.constant 0 : index
      %c0_32 = arith.constant 0 : index
      %57 = vector.load %arg8[%c0_31, %c0_32] : memref<16x1xf32, #tpu.memory_space<vmem>>, vector<16x1xf32>
      tpu.vector_store %arg8[%c0_31, %c0_32], %56 {strides = array<i32>} : memref<16x1xf32, #tpu.memory_space<vmem>>, vector<16x1xf32>,
      %cst_33 = arith.constant 0.000000e+00 : f32
      %58 = vector.broadcast %cst_33 : f32 to vector<16x1xf32>
      %c0_34 = arith.constant 0 : index
      %c0_35 = arith.constant 0 : index
      %59 = vector.load %arg9[%c0_34, %c0_35] : memref<16x1xf32, #tpu.memory_space<vmem>>, vector<16x1xf32>
      tpu.vector_store %arg9[%c0_34, %c0_35], %58 {strides = array<i32>} : memref<16x1xf32, #tpu.memory_space<vmem>>, vector<16x1xf32>,
    } else {
    }
    %c0 = arith.constant 0 : index
    %c0_1 = arith.constant 0 : index
    %3 = vector.load %arg2[%c0, %c0_1] : memref<16x128xf32, #tpu.memory_space<vmem>>, vector<16x128xf32>
    %c0_2 = arith.constant 0 : index
    %c0_3 = arith.constant 0 : index
    %4 = vector.load %arg3[%c0_2, %c0_3] : memref<16x128xbf16, #tpu.memory_space<vmem>>, vector<16x128xbf16>
    %c0_4 = arith.constant 0 : index
    %c0_5 = arith.constant 0 : index
    %5 = vector.load %arg4[%c0_4, %c0_5] : memref<16x1xf32, #tpu.memory_space<vmem>>, vector<16x1xf32>
    %c0_6 = arith.constant 0 : index
    %c0_7 = arith.constant 0 : index
    %6 = vector.load %arg5[%c0_6, %c0_7] : memref<128x128xbf16, #tpu.memory_space<vmem>>, vector<128x128xbf16>
    %cst = arith.constant dense<0.000000e+00> : vector<16x128xf32>
    %7 = tpu.matmul %4, %6, %cst {dimension_numbers = #tpu.dot_dimension_numbers<[1], [0], [0], [1], [0, 0, 1, 1], [], []>} : vector<16x128xbf16>, vector<128x128xbf16>, vector<16x128xf32> -> vector<16x128xf32>
    %c0_8 = arith.constant 0 : index
    %c0_9 = arith.constant 0 : index
    %8 = vector.load %arg7[%c0_8, %c0_9] : memref<16x1xf32, #tpu.memory_space<vmem>>, vector<16x1xf32>
    %9 = vector.broadcast %8 : vector<16x1xf32> to vector<16x128xf32>
    %10 = arith.addf %7, %9 : vector<16x128xf32>
    %11 = tpu.iota {dimensions = array<i32: 1>} : vector<16x128xi32>
    %12 = arith.sitofp %11 : vector<16x128xi32> to vector<16x128xf32>
    %cst_10 = arith.constant 1.000000e+00 : f32
    %13 = vector.broadcast %cst_10 : f32 to vector<16x128xf32>
    %14 = arith.addf %12, %13 : vector<16x128xf32>
    %c128_i32 = arith.constant 128 : i32
    %15 = arith.muli %arg1, %c128_i32 : i32
    %16 = arith.sitofp %15 : i32 to f32
    %17 = vector.broadcast %16 : f32 to vector<16x128xf32>
    %18 = arith.addf %14, %17 : vector<16x128xf32>
    %19 = arith.subf %18, %10 : vector<16x128xf32>
    %20 = vector.broadcast %5 : vector<16x1xf32> to vector<16x128xf32>
    %21 = arith.subf %20, %10 : vector<16x128xf32>
    %22 = vector.broadcast %5 : vector<16x1xf32> to vector<16x128xf32>
    %23 = arith.addf %22, %19 : vector<16x128xf32>
    %24 = tpu.reciprocal %23 {approx = true} : vector<16x128xf32> -> vector<16x128xf32>
    %25 = arith.mulf %23, %24 : vector<16x128xf32>
    %cst_11 = arith.constant 2.000000e+00 : f32
    %26 = vector.broadcast %cst_11 : f32 to vector<16x128xf32>
    %27 = arith.subf %26, %25 : vector<16x128xf32>
    %28 = arith.mulf %24, %27 : vector<16x128xf32>
    %29 = arith.mulf %21, %28 : vector<16x128xf32>
    %cst_12 = arith.constant 1.000000e+00 : f32
    %30 = vector.broadcast %cst_12 : f32 to vector<16x128xf32>
    %31 = arith.subf %30, %29 : vector<16x128xf32>
    %c1_i32 = arith.constant 1 : i32
    %32 = tpu.dynamic_rotate %31 by %c1_i32 dim 1 : vector<16x128xf32>, i32 -> vector<16x128xf32>
    %33 = tpu.iota {dimensions = array<i32: 1>} : vector<16x128xi32>
    %c0_i32_13 = arith.constant 0 : i32
    %34 = vector.broadcast %c0_i32_13 : i32 to vector<16x128xi32>
    %35 = arith.cmpi eq, %33, %34 : vector<16x128xi32>
    %c0_14 = arith.constant 0 : index
    %c0_15 = arith.constant 0 : index
    %36 = vector.load %arg8[%c0_14, %c0_15] : memref<16x1xf32, #tpu.memory_space<vmem>>, vector<16x1xf32>
    %37 = vector.shape_cast %36 : vector<16x1xf32> to vector<16x1xf32>
    %38 = vector.broadcast %37 : vector<16x1xf32> to vector<16x128xf32>
    %39 = arith.select %35, %38, %32 : vector<16x128xi1>, vector<16x128xf32>
    %40 = arith.subf %31, %39 : vector<16x128xf32>
    %c0_16 = arith.constant 0 : index
    %c0_17 = arith.constant 0 : index
    %41 = vector.load %arg9[%c0_16, %c0_17] : memref<16x1xf32, #tpu.memory_space<vmem>>, vector<16x1xf32>
    %42 = arith.mulf %3, %40 : vector<16x128xf32>
    %cst_18 = arith.constant dense<0.000000e+00> : vector<16xf32>
    %43 = vector.multi_reduction <add>, %42, %cst_18 [1] : vector<16x128xf32> to vector<16xf32>
    %44 = vector.shape_cast %43 : vector<16xf32> to vector<16x1xf32>
    %45 = arith.addf %41, %44 : vector<16x1xf32>
    %c0_19 = arith.constant 0 : index
    %c0_20 = arith.constant 0 : index
    %46 = vector.load %arg9[%c0_19, %c0_20] : memref<16x1xf32, #tpu.memory_space<vmem>>, vector<16x1xf32>
    tpu.vector_store %arg9[%c0_19, %c0_20], %45 {strides = array<i32>} : memref<16x1xf32, #tpu.memory_space<vmem>>, vector<16x1xf32>,
    %47 = vector.extract_strided_slice %10 {offsets = [0, 127], sizes = [16, 1], strides = [1, 1]} : vector<16x128xf32> to vector<16x1xf32>
    %c0_21 = arith.constant 0 : index
    %c0_22 = arith.constant 0 : index
    %48 = vector.load %arg7[%c0_21, %c0_22] : memref<16x1xf32, #tpu.memory_space<vmem>>, vector<16x1xf32>
    tpu.vector_store %arg7[%c0_21, %c0_22], %47 {strides = array<i32>} : memref<16x1xf32, #tpu.memory_space<vmem>>, vector<16x1xf32>,
    %49 = vector.extract_strided_slice %31 {offsets = [0, 127], sizes = [16, 1], strides = [1, 1]} : vector<16x128xf32> to vector<16x1xf32>
    %c0_23 = arith.constant 0 : index
    %c0_24 = arith.constant 0 : index
    %50 = vector.load %arg8[%c0_23, %c0_24] : memref<16x1xf32, #tpu.memory_space<vmem>>, vector<16x1xf32>
    tpu.vector_store %arg8[%c0_23, %c0_24], %49 {strides = array<i32>} : memref<16x1xf32, #tpu.memory_space<vmem>>, vector<16x1xf32>,
    %c1_i32_25 = arith.constant 1 : i32
    %51 = arith.cmpi eq, %arg1, %c1_i32_25 : i32
    %52 = arith.extui %51 : i1 to i32
    %c0_i32_26 = arith.constant 0 : i32
    %53 = arith.cmpi ne, %52, %c0_i32_26 : i32
    scf.if %53 {
      %c0_27 = arith.constant 0 : index
      %c0_28 = arith.constant 0 : index
      %54 = vector.load %arg9[%c0_27, %c0_28] : memref<16x1xf32, #tpu.memory_space<vmem>>, vector<16x1xf32>
      %55 = vector.shape_cast %54 : vector<16x1xf32> to vector<16x1xf32>
      %56 = vector.broadcast %55 : vector<16x1xf32> to vector<16x128xf32>
      %c0_29 = arith.constant 0 : index
      %c0_30 = arith.constant 0 : index
      %57 = vector.load %arg6[%c0_29, %c0_30] : memref<16x128xf32, #tpu.memory_space<vmem>>, vector<16x128xf32>
      tpu.vector_store %arg6[%c0_29, %c0_30], %56 {strides = array<i32>} : memref<16x128xf32, #tpu.memory_space<vmem>>, vector<16x128xf32>,
    } else {
    }
    return
  }
  func.func @transform_0(%arg0: i32, %arg1: i32) -> (i32, i32) {
    %c0_i32 = arith.constant 0 : i32
    return %arg0, %arg1 : i32, i32
  }
  func.func @transform_1(%arg0: i32, %arg1: i32) -> (i32, i32) {
    %c0_i32 = arith.constant 0 : i32
    return %arg0, %arg1 : i32, i32
  }
  func.func @transform_2(%arg0: i32, %arg1: i32) -> (i32, i32) {
    %c0_i32 = arith.constant 0 : i32
    %c0_i32_0 = arith.constant 0 : i32
    return %arg0, %c0_i32 : i32, i32
  }
  func.func @transform_3(%arg0: i32, %arg1: i32) -> (i32, i32) {
    %c0_i32 = arith.constant 0 : i32
    %c0_i32_0 = arith.constant 0 : i32
    %c0_i32_1 = arith.constant 0 : i32
    return %c0_i32, %c0_i32_0 : i32, i32
  }
  func.func @transform_4(%arg0: i32, %arg1: i32) -> (i32, i32) {
    %c0_i32 = arith.constant 0 : i32
    %c0_i32_0 = arith.constant 0 : i32
    return %arg0, %c0_i32 : i32, i32
  }
}

</mosaic_0001>

<bundles_post_ra>
// kernel: neg.3
= control target key start
LH: loop header
LB: loop body
LE: loop exit
PB: predicated region body
PF: predicated region fallthrough
CT: control target
= control target key end

     0   :  { %s72_s0 = inlined_call_operand.vmem [shape: f32[2,4,256], index: 0, kind: input, shape index: {}]   ;;  %s73_s1 = inlined_call_operand.vmem [shape: f32[2,4,256], index: 1, kind: output, shape index: {}]  }
   0x1   :  { %v2_v0 = vld [vmem:[%s72_s0] sm:$0xf]  ;;  %v32_v1 = vld [vmem:[%s72_s0 + $0x8] sm:$0xf]  ;;  %v34_v2 = vld [vmem:[%s72_s0 + $0x4] sm:$0xf] }
   0x2   :  { %v5_v3 = vxor.u32 2147483648, %v2_v0  ;;  %v12_v4 = vxor.u32 2147483648, %v32_v1  ;;  %v20_v5 = vxor.u32 2147483648, %v34_v2  ;;  %v36_v6 = vld [vmem:[%s72_s0 + $0xc] sm:$0xf] }
   0x3   :  { %v28_v7 = vxor.u32 2147483648, %v36_v6 }
   0x4   :  { %7 = vst [vmem:[%s73_s1] sm:$0xf] %v5_v3  ;;  %33 = vst [vmem:[%s73_s1 + $0x8] sm:$0xf] %v12_v4 }
   0x5   :  { %35 = vst [vmem:[%s73_s1 + $0x4] sm:$0xf] %v20_v5  ;;  %37 = vst [vmem:[%s73_s1 + $0xc] sm:$0xf] %v28_v7 }

// kernel: squeeze.1
= control target key start
LH: loop header
LB: loop body
LE: loop exit
PB: predicated region body
PF: predicated region fallthrough
CT: control target
= control target key end

     0   :  { %vm7_vm0 = vcmask 31744   ;;  %s39_s0 = inlined_call_operand.vmem [shape: f32[8], index: 0, kind: input, shape index: {}]   ;;  %s40_s1 = inlined_call_operand.vmem [shape: f32[2,4], index: 1, kind: output, shape index: {}]  }
   0x1   :  { %v4_v0 = vld [vmem:[%s39_s0] sm:$0x1]  ;;  %s22_s0 = smov 124  }
   0x2   :  { %5 = vst [vmem:[#allocation1] sm:$0x1] %v4_v0 }
   0x9   :  { %v9_v1 = vld [vmem:[#allocation1] sm:$0x1]  }
   0xa   :  { %v6_v2 = vld [vmem:[#allocation1] sm:$0x1]   ;;  %10 = vrot.lane.b32.xlu0 %v9_v1, %s22_s0 }
   0xb   :  { %8 = vst.msk [vmem:[#allocation0] sm:$0x1] %vm7_vm0, %v6_v2  }
  0x7c   :  { %v11_v3 = vpop.permute.xlu0 %10  }
  0x7d   :  { %14 = vst.msk [vmem:[#allocation0 + $0x1] sm:$0x1] %vm7_vm0, %v11_v3  }
  0x84   :  { %v18_v4 = vld [vmem:[#allocation0] sm:$0x3] }
  0x85   :  { %20 = vst [vmem:[%s40_s1] sm:$0x3] %v18_v4 }

// kernel: mismatch_loss.1
= control target key start
LH: loop header
LB: loop body
LE: loop exit
PB: predicated region body
PF: predicated region fallthrough
CT: control target
= control target key end

     0   :  { %s891_s15 = smov 0   ;;  %s893_s16 = smov 0   ;;  %s1022_s0 = inlined_call_operand.vmem [shape: f32[16,256], index: 0, kind: input, shape index: {}]   ;;  %s1023_s1 = inlined_call_operand.vmem [shape: bf16[16,256], index: 1, kind: input, shape index: {}]   ;;  %s1024_s2 = inlined_call_operand.vmem [shape: f32[16,1], index: 2, kind: input, shape index: {}]   ;;  %s1025_s3 = inlined_call_operand.vmem [shape: bf16[128,128], index: 3, kind: input, shape index: {}]   ;;  %s1026_s4 = inlined_call_operand.vmem [shape: f32[16,128], index: 4, kind: output, shape index: {}]  }
   0x1   :  { %s895_s17 = smov 0   ;;  %s897_s18 = smov 0  }
   0x2   :  { %s899_s19 = smov 0  }
   0x3 LB: > { %s23_s20 = sadd.s32 1, %s854_s18  ;;  %p42_p1 = scmp.ne.s32.totalorder %s846_s16, %s842_s15  ;;  %s858_s19 = sphi %s899_s19, %s14_s19   ;;  %s854_s18 = sphi %s897_s18, %s1031_s18   ;;  %s850_s17 = sphi %s895_s17, %s1030_s17   ;;  %s846_s16 = sphi %s893_s16, %s1029_s16   ;;  %s842_s15 = sphi %s891_s15, %s1028_s15  }
   0x4   : > { %p24_p0 = scmp.ge.s32.totalorder %s23_s20, 2  ;;  %p43_p2 = scmp.eq.s32.totalorder %s858_s19, 0 }
   0x5   : > { %s35_s23 = sadd.s32 1, %s846_s16  ;;  %p705_p5 = scmp.ge.s32.totalorder %s858_s19, 2 }
   0x6   : > { %s1033_s20 = smov (%p24_p0, %s23_s20), 0  ;;  %p922_p3 = por %p43_p2, %p42_p1 }
   0x7   : > { %s31_s22 = ssub.s32 %s854_s18, %s1033_s20  ;;  %181 = sbr.rel (%p705_p5) target bundleno = 28 (0x1c), region = 24 }
   0x8   : > { %p33_p4 = scmp.eq.s32.totalorder %s31_s22, 0 }
   0xa   : > { %s930_s24 = scalar_select %p33_p4, %s846_s16, %s35_s23  }
   0xe   : > { %184 = sbr.rel (!%p922_p3) target bundleno = 21 (0x15), region = 28  ;;  %s186_s25 = sand.u32 (%p922_p3), 1, %s846_s16  }
   0xf   : > { %s707_s26 = sshll.u32 (%p922_p3), %s854_s18, 3  ;;  %s706_s27 = sshll.u32 (%p922_p3), %s186_s25, 4 }
  0x10   : > { %s193_s30 = scalar_lea.vmem (%p922_p3), %s1022_s0, %s707_s26  ;;  %s188_s5 = scalar_lea.vmem (%p922_p3), [#allocation5], %s706_s27 }
  0x11   : > { %v223_v0 = vld [vmem:[%s193_s30] sm:$0xff] (%p922_p3)  ;;  %v225_v1 = vld [vmem:[%s193_s30 + $0x10] sm:$0xff] (%p922_p3) }
  0x12   : > { %224 = vst [vmem:[%s188_s5] sm:$0xff] (%p922_p3), %v223_v0  ;;  %226 = vst [vmem:[%s188_s5 + $0x8] sm:$0xff] (%p922_p3), %v225_v1 }
  0x15 PF: > { %232 = sbr.rel (!%p922_p3) target bundleno = 28 (0x1c), region = 66  ;;  %s234_s6 = sand.u32 (%p922_p3), 1, %s846_s16  }
  0x16   : > { %s709_s7 = sshll.u32 (%p922_p3), %s854_s18, 2  ;;  %s708_s8 = sshll.u32 (%p922_p3), %s234_s6, 3 }
  0x17   : > { %s241_s11 = scalar_lea.vmem (%p922_p3), %s1023_s1, %s709_s7  ;;  %s236_s12 = scalar_lea.vmem (%p922_p3), [#allocation6], %s708_s8 }
  0x18   : > { %v257_v2 = vld [vmem:[%s241_s11] sm:$0xf] (%p922_p3)  ;;  %v259_v3 = vld [vmem:[%s241_s11 + $0x8] sm:$0xf] (%p922_p3) }
  0x19   : > { %258 = vst [vmem:[%s236_s12] sm:$0xf] (%p922_p3), %v257_v2  ;;  %260 = vst [vmem:[%s236_s12 + $0x4] sm:$0xf] (%p922_p3), %v259_v3 }
  0x1c PF: > { %p710_p6 = scmp.ge.s32.totalorder %s858_s19, 1  ;;  %p286_p7 = scmp.lt.s32.totalorder %s858_s19, 3 }
  0x1e   : > { %p287_p8 = pnand %p710_p6, %p286_p7 }
  0x1f   : > { %s293_s13 = sand.u32 (!%p287_p8), 1, %s842_s15   ;;  %p713_p9 = scmp.ne.s32.totalorder (!%p287_p8), %s850_s17, 0 }
  0x20   : > { %290 = sbr.rel (%p287_p8) target bundleno = 723 (0x2d3), region = 107  ;;  %s950_s14 = sshll.u32 (!%p287_p8), %s293_s13, 4 }
  0x21   : > { %s952_s21 = sshll.u32 (!%p287_p8), %s293_s13, 3  ;;  %s295_s22 = scalar_lea.vmem (!%p287_p8), [#allocation5], %s950_s14 }
  0x22   : > { %s302_s23 = scalar_lea.vmem (!%p287_p8), [#allocation6], %s952_s21 }
  0x27   : > { %352 = sbr.rel (%p713_p9) target bundleno = 46 (0x2e), region = 119  ;;  %vm353_vm0 = vcmask (!%p713_p9), 7168   ;;  %v860_v4 = vmov (!%p713_p9), 0.0  }
  0x28   : > { %354 = vst.msk [vmem:[#allocation2] sm:$0xff] (!%p713_p9), %vm353_vm0, %v860_v4  ;;  %355 = vst.msk [vmem:[#allocation2 + $0x8] sm:$0xff] (!%p713_p9), %vm353_vm0, %v860_v4 }
  0x29   : > { %356 = vst.msk [vmem:[#allocation3] sm:$0xff] (!%p713_p9), %vm353_vm0, %v860_v4  ;;  %357 = vst.msk [vmem:[#allocation3 + $0x8] sm:$0xff] (!%p713_p9), %vm353_vm0, %v860_v4 }
  0x2a   : > { %358 = vst.msk [vmem:[#allocation4] sm:$0xff] (!%p713_p9), %vm353_vm0, %v860_v4  ;;  %359 = vst.msk [vmem:[#allocation4 + $0x8] sm:$0xff] (!%p713_p9), %vm353_vm0, %v860_v4 }
  0x2e PF: > { %v806_v5 = vld [vmem:[%s1025_s3] sm:$0xff]   ;;  %v861_v6 = vmov 0.0   ;;  %v807_v7 = vld [vmem:[%s1025_s3 + $0x8] sm:$0xff]   ;;  %vm862_vm1 = vmmov 0   ;;  %v863_v8 = vmov 0   ;;  %v808_v9 = vld [vmem:[%s1025_s3 + $0x10] sm:$0xff]   ;;  %v489_v22 = vlaneseq }
  0x2f   : > { %738 = vmatprep.subr.bf16.mxu0 %v861_v6  ;;  %754 = vmatprep.mubr.msk.bf16.mxu0 %vm862_vm1, %v861_v6  ;;  %v382_v10 = vld [vmem:[#allocation2] sm:$0xff]  ;;  %v809_v12 = vld [vmem:[%s1025_s3 + $0x18] sm:$0xff]   ;;  %v383_v13 = vld [vmem:[#allocation2 + $0x8] sm:$0xff]  ;;  %s723_s28 = sshll.u32 %s850_s17, 7  ;;  %s864_s21 = smov 1   ;;  %vm556_vm3 = vcmask 7168  }
  0x30   : > { %739 = vmatpush3.bf16.msra.mxu0 %v806_v5  ;;  %804 = vset.pattern.permute.xlu0 %v863_v8  ;;  %v364_v11 = vld [vmem:[%s1024_s2] sm:$0xff]  ;;  %v365_v14 = vld [vmem:[%s1024_s2 + $0x8] sm:$0xff]  ;;  %v530_v16 = vld [vmem:[#allocation3] sm:$0xff]  ;;  %v490_v23 = vand.u32 127, %v489_v22  ;;  %s494_s29 = scvt.s32.f32 %s723_s28  ;;  %p724_p10 = scmp.ne.s32.totalorder %s850_s17, 1 }
  0x31   : > { %740 = vmatprep.subr.bf16.mxu0 %v861_v6  ;;  %805 = vset.pattern.permute.xlu1 %v863_v8  ;;  %v810_v15 = vld [vmem:[%s1025_s3 + $0x20] sm:$0xff]   ;;  %v531_v17 = vld [vmem:[#allocation3 + $0x8] sm:$0xff]  ;;  %v811_v18 = vld [vmem:[%s1025_s3 + $0x28] sm:$0xff]  }
  0x32   : > { %386 = vperm.xlu0 %804, %v382_v10   ;;  %501 = vperm.xlu1 %805, %v364_v11   ;;  %v812_v19 = vld [vmem:[%s1025_s3 + $0x30] sm:$0xff]   ;;  %v813_v20 = vld [vmem:[%s1025_s3 + $0x38] sm:$0xff]   ;;  %v491_v24 = vcvt.s32.f32 %v490_v23  ;;  %v495_v27 = vstv %s494_s29  ;;  %vm529_vm2 = vcmp.eq.s32.totalorder %v490_v23, 0  ;;  %v547_v8 = vld [vmem:[#allocation4 + $0x8] sm:$0xff] }
  0x33   : > { %v814_v21 = vld [vmem:[%s302_s23] sm:$0xff]   ;;  %v361_v0 = vld [vmem:[%s295_s22 + $0x8] sm:$0xff] }
  0x34   : > { %741 = vmatpush3.bf16.msra.mxu0 %v807_v7  ;;  %v492_v25 = vadd.f32 1.0, %v491_v24  ;;  %v360_v60 = vld [vmem:[%s295_s22] sm:$0xff] }
  0x35   : > { %742 = vmatprep.subr.bf16.mxu0 %v861_v6 }
  0x36   : > { %391 = vperm.xlu0 %804, %v383_v13   ;;  %506 = vperm.xlu1 %805, %v365_v14   ;;  %v496_v28 = vadd.f32 %v495_v27, %v492_v25 }
  0x38   : > { %743 = vmatpush3.bf16.msra.mxu0 %v808_v9 }
  0x39   : > { %744 = vmatprep.subr.bf16.mxu0 %v861_v6 }
  0x3a   : > { %534 = vperm.xlu0 %804, %v530_v16   ;;  %539 = vperm.xlu1 %805, %v531_v17  }
  0x3c   : > { %745 = vmatpush3.bf16.msra.mxu0 %v809_v12 }
  0x3d   : > { %746 = vmatprep.subr.bf16.mxu0 %v861_v6 }
  0x40   : > { %747 = vmatpush3.bf16.msra.mxu0 %v810_v15  ;;  %v865_v15 = vmov (!%p724_p10), 0  }
  0x41   : > { %748 = vmatprep.subr.bf16.mxu0 %v861_v6  ;;  %819 = vset.pattern.permute.xlu0 (!%p724_p10), %v865_v15 }
  0x44   : > { %749 = vmatpush3.bf16.msra.mxu0 %v811_v18 }
  0x45   : > { %750 = vmatprep.subr.bf16.mxu0 %v861_v6 }
  0x48   : > { %751 = vmatpush3.bf16.msra.mxu0 %v812_v19 }
  0x49   : > { %752 = vmatprep.subr.bf16.mxu0 %v861_v6  ;;  %v546_v6 = vld [vmem:[#allocation4] sm:$0xff] }
  0x4c   : > { %753 = vmatpush3.bf16.msra.mxu0 %v813_v20 }
  0x4f   : > { %755 = vmatmul.mubr.bf16.vlgmr.msra.gmra.mrb[0].mxu0 %v814_v21 }
  0xb1   : > { %v387_v26 = vpop.permute.xlu0 %386  ;;  %v502_v29 = vpop.permute.xlu1 %501 }
  0xb5   : > { %v392_v33 = vpop.permute.xlu0 %391  ;;  %v507_v40 = vpop.permute.xlu1 %506 }
  0xb9   : > { %v535_v56 = vpop.permute.xlu0 %534  ;;  %v540_v57 = vpop.permute.xlu1 %539 }
 0x122   : > { %v482_v30 = vpop.f32.mrb[0].mxu0 }
 0x123   : > { %v483_v31 = vadd.f32 %v482_v30, %v387_v26  ;;  %v756_v32 = vpop.f32.mrb[1].mxu0 }
 0x124   : > { %v485_v34 = vpop.f32.mrb[2].mxu0 }
 0x125   : > { %v497_v35 = vsub.f32 %v496_v28, %v483_v31  ;;  %v486_v36 = vadd.f32 %v485_v34, %v392_v33  ;;  %v757_v37 = vpop.f32.mrb[3].mxu0  ;;  %v509_v47 = vsub.f32 %v502_v29, %v483_v31 }
 0x127   : > { %v511_v38 = vadd.f32 %v502_v29, %v497_v35  ;;  %v498_v39 = vsub.f32 %v496_v28, %v486_v36  ;;  %v510_v50 = vsub.f32 %v507_v40, %v486_v36 }
 0x129   : > { %815 = vrcp.f32 %v511_v38  ;;  %v512_v41 = vadd.f32 %v507_v40, %v498_v39 }
 0x12b   : > { %817 = vrcp.f32 %v512_v41 }
 0x133   : > { %v816_v42 = vpop.eup %815 }
 0x134   : > { %v515_v43 = vmul.f32 %v816_v42, %v511_v38 }
 0x135   : > { %v818_v44 = vpop.eup %817 }
 0x136   : > { %v517_v45 = vsub.f32 2.0, %v515_v43  ;;  %v516_v46 = vmul.f32 %v818_v44, %v512_v41 }
 0x138   : > { %v519_v48 = vmul.f32 %v816_v42, %v517_v45  ;;  %v518_v49 = vsub.f32 2.0, %v516_v46 }
 0x13a   : > { %v521_v51 = vmul.f32 %v519_v48, %v509_v47  ;;  %v520_v52 = vmul.f32 %v818_v44, %v518_v49 }
 0x13c   : > { %v523_v53 = vsub.f32 1.0, %v521_v51  ;;  %v522_v54 = vmul.f32 %v520_v52, %v510_v50 }
 0x13e   : > { %525 = vrot.lane.b32.xlu0 %v523_v53, %s864_s21  ;;  %v524_v55 = vsub.f32 1.0, %v522_v54 }
 0x140   : > { %527 = vrot.lane.b32.xlu1 %v524_v55, %s864_s21 }
 0x142   : > { %561 = vrot.lane.b32.xlu0 %v483_v31, %s864_s21 }
 0x144   : > { %563 = vrot.lane.b32.xlu1 %v486_v36, %s864_s21 }
 0x1b0   : > { %v526_v58 = vpop.permute.xlu0 %525 }
 0x1b1   : > { %v542_v59 = vsel %vm529_vm2, %v535_v56, %v526_v58 }
 0x1b2   : > { %v544_v61 = vsub.f32 %v523_v53, %v542_v59  ;;  %v528_v62 = vpop.permute.xlu1 %527 }
 0x1b3   : > { %v543_v63 = vsel %vm529_vm2, %v540_v57, %v528_v62 }
 0x1b4   : > { %v545_v1 = vsub.f32 %v524_v55, %v543_v63  ;;  %v562_v2 = vpop.permute.xlu0 %561  ;;  %v548_v3 = vmul.f32 %v544_v61, %v360_v60 }
 0x1b5   : > { %567 = vst.msk [vmem:[#allocation2] sm:$0xff] %vm556_vm3, %v562_v2 }
 0x1b6   : > { %v564_v4 = vpop.permute.xlu1 %563  ;;  %550 = vadd.xlane.f32.xlu0 %v548_v3  ;;  %v549_v5 = vmul.f32 %v545_v1, %v361_v0 }
 0x1b7   : > { %568 = vst.msk [vmem:[#allocation2 + $0x8] sm:$0xff] %vm556_vm3, %v564_v4 }
 0x1b8   : > { %552 = vadd.xlane.f32.xlu1 %v549_v5 }
 0x1c9   : > { %573 = vrot.lane.b32.xlu1 %v524_v55, %s864_s21 }
 0x1cc   : > { %571 = vrot.lane.b32.xlu0 %v523_v53, %s864_s21 }
 0x243   : > { %v551_v7 = vpop.xlane.xlu0 %550 }
 0x244   : > { %v554_v9 = vadd.f32 %v551_v7, %v546_v6  ;;  %582 = sbr.rel (%p724_p10) target bundleno = 723 (0x2d3), region = 123 }
 0x245   : > { %v553_v10 = vpop.xlane.xlu1 %552 }
 0x246   : > { %557 = vst.msk [vmem:[#allocation4] sm:$0xff] %vm556_vm3, %v554_v9  ;;  %v555_v11 = vadd.f32 %v553_v10, %v547_v8 }
 0x247   : > { %v572_v12 = vpop.permute.xlu0 %571 }
 0x248   : > { %558 = vst.msk [vmem:[#allocation4 + $0x8] sm:$0xff] %vm556_vm3, %v555_v11  ;;  %577 = vst.msk [vmem:[#allocation3] sm:$0xff] %vm556_vm3, %v572_v12 }
 0x249   : > { %v574_v13 = vpop.permute.xlu1 %573 }
 0x24a   : > { %578 = vst.msk [vmem:[#allocation3 + $0x8] sm:$0xff] %vm556_vm3, %v574_v13 }
 0x24d   : > { %v583_v14 = vld [vmem:[#allocation4] sm:$0xff] }
 0x24e   : > { %587 = vperm.xlu0 %819, %v583_v14  }
 0x24f   : > { %v584_v16 = vld [vmem:[#allocation4 + $0x8] sm:$0xff] }
 0x252   : > { %592 = vperm.xlu0 %819, %v584_v16  }
 0x2cd   : > { %v588_v17 = vpop.permute.xlu0 %587 }
 0x2ce   : > { %595 = vst [vmem:[%s1026_s4] sm:$0xff] %v588_v17 }
 0x2d1   : > { %v593_v18 = vpop.permute.xlu0 %592 }
 0x2d2   : > { %596 = vst [vmem:[%s1026_s4 + $0x8] sm:$0xff] %v593_v18 }
 0x2d3 PF: > { %s14_s19 = sadd.s32 1, %s858_s19   ;;  %s1028_s15 = smov %s846_s16 }
 0x2d4   : > { %p11_p11 = scmp.ge.s32.totalorder %s14_s19, 4   ;;  %s1029_s16 = smov %s930_s24 }
 0x2d5   : > { %s1030_s17 = smov %s854_s18  ;;  %s1031_s18 = smov %s1033_s20 }
 0x2d6   :  { %13 = sbr.rel (!%p11_p11) target bundleno = 3 (0x3), region = 169 }

</bundles_post_ra>
